<compile_context>
chip_gen: v5e
topology: v5e:2x2
jax: 0.10.0
libtpu: 0.0.40
codegen_flags: <defaults>
</compile_context>

<pallas_src>
import jax
import jax.numpy as jnp
from jax.experimental import pallas as pl
from jax.experimental.pallas import tpu as pltpu

_BLOCK_BYTES_CAP = 8 * 1024 * 1024    # <= 8 MiB/block: double-buffered in+out
                                      # footprint ~32 MiB -> safe on v7x
                                      # (64 MiB VMEM), ample on v5e/v6e.
_VMEM_LIMIT_BYTES = 48 * 1024 * 1024  # above the 16/32 MiB scoped defaults,
                                      # below v7x's 64 MiB physical VMEM.
_SMALL_BYTES = 128 * 1024             # below this the fixed launch/DMA
                                      # overhead dwarfs the work; let XLA fuse.
_MIN_STEPS_BYTES = 2 * 1024 * 1024    # above this, force >= ~4 grid steps so
                                      # the pipeline + both v7x TCs engage.


def _round_up(x: int, m: int) -> int:
    return ((x + m - 1) // m) * m


def _round_down(x: int, m: int) -> int:
    return (x // m) * m


def _scale2_kernel(a_ref, o_ref):
    # Hot path: y = 2 * a.  Weakly-typed 2 keeps the input dtype (f32 stays
    # f32, int stays int).  One VPU multiply per vreg; DMA-bound by design.
    o_ref[...] = a_ref[...] * 2


def custom_op_example_forward(
    a: jax.Array,
    *,
    block_bytes_cap: int = _BLOCK_BYTES_CAP,
    small_bytes: int = _SMALL_BYTES,
    donate_input: bool = False,
) -> jax.Array:
    """y = 2 * a for a rank-2 array, via a Pallas TPU streaming kernel."""
    assert a.ndim == 2, "module is annotated for rank-2 (float32) input"
    M, N = a.shape
    itemsize = jnp.dtype(a.dtype).itemsize
    total_bytes = M * N * itemsize

    # Fast path: tiny inputs are strictly faster as a fused XLA elementwise op
    # (a pallas_call is an opaque fusion barrier).
    if total_bytes <= small_bytes:
        return a * 2

    # Sublane tile for this dtype: 8 rows (f32), 16 (bf16), 32 (int8/fp8).
    sub = max(8, 32 // itemsize)
    row_bytes = N * itemsize

    cost = pl.CostEstimate(
        flops=M * N, transcendentals=0, bytes_accessed=2 * total_bytes
    )

    if sub * row_bytes > block_bytes_cap:
        # Very wide rows: even `sub` full-width rows overflow the block cap,
        # so tile columns too (2D grid, 128-lane-aligned column blocks).
        bm = min(sub, M)
        bn = max(128, _round_down(block_bytes_cap // (bm * itemsize), 128))
        bn = min(bn, N)
        grid = (pl.cdiv(M, bm), pl.cdiv(N, bn))
        in_specs = [pl.BlockSpec((bm, bn), lambda i, j: (i, j))]
        out_spec = pl.BlockSpec((bm, bn), lambda i, j: (i, j))
        dims = ("parallel", "parallel")
    else:
        # 1D grid over rows; last dim full-extent (lane-dense, legal
        # regardless of 128-divisibility because it equals the array dim).
        bm = max(sub, _round_down(block_bytes_cap // row_bytes, sub))
        # Keep >= ~4 grid steps on mid/large inputs so the double buffer
        # pipelines and the parallel axis shards across v7x's 2 TensorCores.
        if total_bytes > _MIN_STEPS_BYTES:
            bm = min(bm, max(sub, _round_up(pl.cdiv(M, 4), sub)))
        bm = min(bm, M)
        grid = (pl.cdiv(M, bm),)
        in_specs = [pl.BlockSpec((bm, N), lambda i: (i, 0))]
        out_spec = pl.BlockSpec((bm, N), lambda i: (i, 0))
        dims = ("parallel",)

    extra = {}
    if donate_input:
        # Halves peak HBM footprint when the caller can donate `a`.
        extra["input_output_aliases"] = {0: 0}

    return pl.pallas_call(
        _scale2_kernel,
        out_shape=jax.ShapeDtypeStruct((M, N), a.dtype),
        grid_spec=pl.GridSpec(grid=grid, in_specs=in_specs, out_specs=out_spec),
        compiler_params=pltpu.CompilerParams(
            dimension_semantics=dims,
            vmem_limit_bytes=_VMEM_LIMIT_BYTES,
        ),
        cost_estimate=cost,
        **extra,
    )(a)


if __name__ == "__main__":
    key = jax.random.PRNGKey(0)
    k1, k2, k3, k4 = jax.random.split(key, 4)

    # (512, 256) f32 = 512 KiB -> 1D kernel path, lane-dense full-extent N.
    a = jax.random.normal(k1, (512, 256), dtype=jnp.float32)
    y = custom_op_example_forward(a)
    jax.block_until_ready(y)
    assert y.shape == a.shape and y.dtype == a.dtype
    assert jnp.allclose(y, 2.0 * a), "mismatch (aligned 1D path)"

    # Non-128-aligned N still goes through the kernel (full-extent last dim).
    b = jax.random.normal(k2, (300, 200), dtype=jnp.float32)
    yb = custom_op_example_forward(b)
    jax.block_until_ready(yb)
    assert jnp.allclose(yb, 2.0 * b), "mismatch (unaligned N)"

    # 4 MiB input: exercises the >=4-grid-step floor (pipelining / megacore).
    c = jax.random.normal(k3, (2048, 512), dtype=jnp.float32)
    yc = custom_op_example_forward(c)
    jax.block_until_ready(yc)
    assert jnp.allclose(yc, 2.0 * c), "mismatch (mid-size multi-step path)"

    # Force the wide-N 2D column-tiled path at a small shape via a tiny cap.
    d = jax.random.normal(k4, (128, 512), dtype=jnp.float32)
    yd = custom_op_example_forward(d, block_bytes_cap=4096)
    jax.block_until_ready(yd)
    assert jnp.allclose(yd, 2.0 * d), "mismatch (column-tiled 2D path)"

    # Tiny input exercises the XLA fast path (skip the kernel launch).
    e = jax.random.normal(key, (8, 32), dtype=jnp.float32)
    ye = custom_op_example_forward(e)
    jax.block_until_ready(ye)
    assert jnp.allclose(ye, 2.0 * e), "mismatch (fast path)"

    print("KERNEL_OK")
</pallas_src>

<mosaic_0001>
module attributes {stable_mosaic.version = 11 : i64} {
  func.func @_scale2_kernel(%arg0: i32, %arg1: memref<512x256xf32, #tpu.memory_space<vmem>>, %arg2: memref<512x256xf32, #tpu.memory_space<vmem>>) attributes {dimension_semantics = [#tpu.dimension_semantics<parallel>], iteration_bounds = array<i64: 1>, scalar_prefetch = 0 : i64, scratch_operands = 0 : i64, tpu.core_type = #tpu.core_type<tc>, window_params = [{transform_indices = @transform_0, window_bounds = array<i64: 512, 256>}, {transform_indices = @transform_1, window_bounds = array<i64: 512, 256>}]} {
    %c0 = arith.constant 0 : index
    %c0_0 = arith.constant 0 : index
    %0 = vector.load %arg1[%c0, %c0_0] : memref<512x256xf32, #tpu.memory_space<vmem>>, vector<512x256xf32>
    %cst = arith.constant 2.000000e+00 : f32
    %1 = vector.broadcast %cst : f32 to vector<512x256xf32>
    %2 = arith.mulf %0, %1 : vector<512x256xf32>
    %c0_1 = arith.constant 0 : index
    %c0_2 = arith.constant 0 : index
    %3 = vector.load %arg2[%c0_1, %c0_2] : memref<512x256xf32, #tpu.memory_space<vmem>>, vector<512x256xf32>
    tpu.vector_store %arg2[%c0_1, %c0_2], %2 {strides = array<i32>} : memref<512x256xf32, #tpu.memory_space<vmem>>, vector<512x256xf32>,
    return
  }
  func.func @transform_0(%arg0: i32) -> (i32, i32) {
    %c0_i32 = arith.constant 0 : i32
    %c0_i32_0 = arith.constant 0 : i32
    return %arg0, %c0_i32 : i32, i32
  }
  func.func @transform_1(%arg0: i32) -> (i32, i32) {
    %c0_i32 = arith.constant 0 : i32
    %c0_i32_0 = arith.constant 0 : i32
    return %arg0, %c0_i32 : i32, i32
  }
}

</mosaic_0001>

<bundles_post_ra>
// kernel: tpu_custom_call.1
= control target key start
LH: loop header
LB: loop body
LE: loop exit
PB: predicated region body
PF: predicated region fallthrough
CT: control target
= control target key end

     0   :  { %6 = vsyncpa [#allocation3], 0  ;;  %s510_s0 = inlined_call_operand.hbm [shape: f32[512,256], index: 0, kind: input, shape index: {}]   ;;  %s511_s1 = inlined_call_operand.hbm [shape: f32[512,256], index: 1, kind: output, shape index: {}]  }
   0x1   :  { %7 = vsyncpa [#allocation4], 0  ;;  %s12_s8 = sshll.u32 %s510_s0, 4  ;;  %s484_s9 = smov [#allocation2]   ;;  %s13_s8 = int_to_ptr.hbm [resolvable:$true] %s12_s8 }
   0x2   :  { %s14_s10 = sshll.u32 %s484_s9, 4  ;;  %s485_s11 = smov 256   ;;  %s15_s10 = int_to_ptr.vmem [resolvable:$true] %s14_s10 }
   0x3   :  { %s486_s12 = smov 16  }
   0x4   :  { %20 = dma.hbm_to_vmem [thread:$0]  %s13_s8, 16384, %s15_s10, [#allocation3], %s485_s11, %s485_s11, %s486_s12  }
   0x5   :  { %480 = dma.done.wait [#allocation3], 16384  }
   0x6   :  { %481 = vsyncadd [#allocation3], 4294950912  ;;  %v25_v0 = vld [vmem:[#allocation2] sm:$0xff]  ;;  %v26_v1 = vld [vmem:[#allocation2 + $0x8] sm:$0xff]  ;;  %s487_s0 = smov [#allocation5]   ;;  %s415_s16 = sshll.u32 %s511_s1, 4  ;;  %s416_s16 = int_to_ptr.hbm [resolvable:$true] %s415_s16 }
   0x7   :  { %v27_v2 = vld [vmem:[#allocation2 + $0x10] sm:$0xff]  ;;  %v153_v3 = vmul.f32 2.0, %v25_v0  ;;  %v154_v4 = vmul.f32 2.0, %v26_v1  ;;  %v28_v6 = vld [vmem:[#allocation2 + $0x18] sm:$0xff]  ;;  %v29_v7 = vld [vmem:[#allocation2 + $0x20] sm:$0xff]  ;;  %s413_s13 = sshll.u32 %s487_s0, 4  ;;  %s414_s13 = int_to_ptr.vmem [resolvable:$true] %s413_s13 }
   0x8   :  { %v155_v5 = vmul.f32 2.0, %v27_v2  ;;  %v30_v8 = vld [vmem:[#allocation2 + $0x28] sm:$0xff]  ;;  %v156_v9 = vmul.f32 2.0, %v28_v6  ;;  %v31_v10 = vld [vmem:[#allocation2 + $0x30] sm:$0xff]  ;;  %v157_v11 = vmul.f32 2.0, %v29_v7  ;;  %v32_v12 = vld [vmem:[#allocation2 + $0x38] sm:$0xff] }
   0x9   :  { %281 = vst [vmem:[#allocation5] sm:$0xff] %v153_v3  ;;  %v158_v13 = vmul.f32 2.0, %v30_v8  ;;  %v33_v14 = vld [vmem:[#allocation2 + $0x40] sm:$0xff]  ;;  %v159_v15 = vmul.f32 2.0, %v31_v10  ;;  %v34_v16 = vld [vmem:[#allocation2 + $0x48] sm:$0xff]  ;;  %v160_v17 = vmul.f32 2.0, %v32_v12 }
   0xa   :  { %282 = vst [vmem:[#allocation5 + $0x8] sm:$0xff] %v154_v4  ;;  %v35_v18 = vld [vmem:[#allocation2 + $0x50] sm:$0xff]  ;;  %v161_v19 = vmul.f32 2.0, %v33_v14  ;;  %v36_v20 = vld [vmem:[#allocation2 + $0x58] sm:$0xff]  ;;  %v162_v21 = vmul.f32 2.0, %v34_v16  ;;  %v37_v22 = vld [vmem:[#allocation2 + $0x60] sm:$0xff] }
   0xb   :  { %283 = vst [vmem:[#allocation5 + $0x10] sm:$0xff] %v155_v5  ;;  %v163_v23 = vmul.f32 2.0, %v35_v18  ;;  %v38_v24 = vld [vmem:[#allocation2 + $0x68] sm:$0xff]  ;;  %v164_v25 = vmul.f32 2.0, %v36_v20  ;;  %v39_v26 = vld [vmem:[#allocation2 + $0x70] sm:$0xff]  ;;  %v165_v27 = vmul.f32 2.0, %v37_v22 }
   0xc   :  { %284 = vst [vmem:[#allocation5 + $0x18] sm:$0xff] %v156_v9  ;;  %v40_v28 = vld [vmem:[#allocation2 + $0x78] sm:$0xff]  ;;  %v166_v29 = vmul.f32 2.0, %v38_v24  ;;  %v41_v30 = vld [vmem:[#allocation2 + $0x80] sm:$0xff]  ;;  %v167_v31 = vmul.f32 2.0, %v39_v26  ;;  %v42_v32 = vld [vmem:[#allocation2 + $0x88] sm:$0xff] }
   0xd   :  { %285 = vst [vmem:[#allocation5 + $0x20] sm:$0xff] %v157_v11  ;;  %v168_v33 = vmul.f32 2.0, %v40_v28  ;;  %v43_v34 = vld [vmem:[#allocation2 + $0x90] sm:$0xff]  ;;  %v169_v35 = vmul.f32 2.0, %v41_v30  ;;  %v44_v36 = vld [vmem:[#allocation2 + $0x98] sm:$0xff]  ;;  %v170_v37 = vmul.f32 2.0, %v42_v32 }
   0xe   :  { %286 = vst [vmem:[#allocation5 + $0x28] sm:$0xff] %v158_v13  ;;  %v45_v38 = vld [vmem:[#allocation2 + $0xa0] sm:$0xff]  ;;  %v171_v39 = vmul.f32 2.0, %v43_v34  ;;  %v46_v40 = vld [vmem:[#allocation2 + $0xa8] sm:$0xff]  ;;  %v172_v41 = vmul.f32 2.0, %v44_v36  ;;  %v47_v42 = vld [vmem:[#allocation2 + $0xb0] sm:$0xff] }
   0xf   :  { %287 = vst [vmem:[#allocation5 + $0x30] sm:$0xff] %v159_v15  ;;  %v173_v43 = vmul.f32 2.0, %v45_v38  ;;  %v48_v44 = vld [vmem:[#allocation2 + $0xb8] sm:$0xff]  ;;  %v174_v45 = vmul.f32 2.0, %v46_v40  ;;  %v49_v46 = vld [vmem:[#allocation2 + $0xc0] sm:$0xff]  ;;  %v175_v47 = vmul.f32 2.0, %v47_v42 }
  0x10   :  { %288 = vst [vmem:[#allocation5 + $0x38] sm:$0xff] %v160_v17  ;;  %v50_v48 = vld [vmem:[#allocation2 + $0xc8] sm:$0xff]  ;;  %v176_v49 = vmul.f32 2.0, %v48_v44  ;;  %v51_v50 = vld [vmem:[#allocation2 + $0xd0] sm:$0xff]  ;;  %v177_v51 = vmul.f32 2.0, %v49_v46  ;;  %v52_v52 = vld [vmem:[#allocation2 + $0xd8] sm:$0xff] }
  0x11   :  { %289 = vst [vmem:[#allocation5 + $0x40] sm:$0xff] %v161_v19  ;;  %v178_v53 = vmul.f32 2.0, %v50_v48  ;;  %v53_v54 = vld [vmem:[#allocation2 + $0xe0] sm:$0xff]  ;;  %v179_v55 = vmul.f32 2.0, %v51_v50  ;;  %v54_v56 = vld [vmem:[#allocation2 + $0xe8] sm:$0xff]  ;;  %v180_v57 = vmul.f32 2.0, %v52_v52 }
  0x12   :  { %290 = vst [vmem:[#allocation5 + $0x48] sm:$0xff] %v162_v21  ;;  %v55_v58 = vld [vmem:[#allocation2 + $0xf0] sm:$0xff]  ;;  %v181_v59 = vmul.f32 2.0, %v53_v54  ;;  %v56_v60 = vld [vmem:[#allocation2 + $0xf8] sm:$0xff]  ;;  %v182_v61 = vmul.f32 2.0, %v54_v56  ;;  %v57_v62 = vld [vmem:[#allocation2 + $0x100] sm:$0xff] }
  0x13   :  { %291 = vst [vmem:[#allocation5 + $0x50] sm:$0xff] %v163_v23  ;;  %v183_v63 = vmul.f32 2.0, %v55_v58  ;;  %v58_v0 = vld [vmem:[#allocation2 + $0x108] sm:$0xff]  ;;  %v184_v1 = vmul.f32 2.0, %v56_v60  ;;  %v59_v2 = vld [vmem:[#allocation2 + $0x110] sm:$0xff]  ;;  %v185_v3 = vmul.f32 2.0, %v57_v62 }
  0x14   :  { %292 = vst [vmem:[#allocation5 + $0x58] sm:$0xff] %v164_v25  ;;  %v60_v4 = vld [vmem:[#allocation2 + $0x118] sm:$0xff]  ;;  %v186_v5 = vmul.f32 2.0, %v58_v0  ;;  %v61_v6 = vld [vmem:[#allocation2 + $0x120] sm:$0xff]  ;;  %v187_v7 = vmul.f32 2.0, %v59_v2  ;;  %v62_v8 = vld [vmem:[#allocation2 + $0x128] sm:$0xff] }
  0x15   :  { %293 = vst [vmem:[#allocation5 + $0x60] sm:$0xff] %v165_v27  ;;  %v188_v9 = vmul.f32 2.0, %v60_v4  ;;  %v63_v10 = vld [vmem:[#allocation2 + $0x130] sm:$0xff]  ;;  %v189_v11 = vmul.f32 2.0, %v61_v6  ;;  %v64_v12 = vld [vmem:[#allocation2 + $0x138] sm:$0xff]  ;;  %v190_v13 = vmul.f32 2.0, %v62_v8 }
  0x16   :  { %294 = vst [vmem:[#allocation5 + $0x68] sm:$0xff] %v166_v29  ;;  %v65_v14 = vld [vmem:[#allocation2 + $0x140] sm:$0xff]  ;;  %v191_v15 = vmul.f32 2.0, %v63_v10  ;;  %v66_v16 = vld [vmem:[#allocation2 + $0x148] sm:$0xff]  ;;  %v192_v17 = vmul.f32 2.0, %v64_v12  ;;  %v67_v18 = vld [vmem:[#allocation2 + $0x150] sm:$0xff] }
  0x17   :  { %295 = vst [vmem:[#allocation5 + $0x70] sm:$0xff] %v167_v31  ;;  %v193_v19 = vmul.f32 2.0, %v65_v14  ;;  %v68_v20 = vld [vmem:[#allocation2 + $0x158] sm:$0xff]  ;;  %v194_v21 = vmul.f32 2.0, %v66_v16  ;;  %v69_v22 = vld [vmem:[#allocation2 + $0x160] sm:$0xff]  ;;  %v195_v23 = vmul.f32 2.0, %v67_v18 }
  0x18   :  { %296 = vst [vmem:[#allocation5 + $0x78] sm:$0xff] %v168_v33  ;;  %v70_v24 = vld [vmem:[#allocation2 + $0x168] sm:$0xff]  ;;  %v196_v25 = vmul.f32 2.0, %v68_v20  ;;  %v71_v26 = vld [vmem:[#allocation2 + $0x170] sm:$0xff]  ;;  %v197_v27 = vmul.f32 2.0, %v69_v22  ;;  %v72_v28 = vld [vmem:[#allocation2 + $0x178] sm:$0xff] }
  0x19   :  { %297 = vst [vmem:[#allocation5 + $0x80] sm:$0xff] %v169_v35  ;;  %v198_v29 = vmul.f32 2.0, %v70_v24  ;;  %v73_v30 = vld [vmem:[#allocation2 + $0x180] sm:$0xff]  ;;  %v199_v31 = vmul.f32 2.0, %v71_v26  ;;  %v74_v32 = vld [vmem:[#allocation2 + $0x188] sm:$0xff]  ;;  %v200_v33 = vmul.f32 2.0, %v72_v28 }
  0x1a   :  { %298 = vst [vmem:[#allocation5 + $0x88] sm:$0xff] %v170_v37  ;;  %v75_v34 = vld [vmem:[#allocation2 + $0x190] sm:$0xff]  ;;  %v201_v35 = vmul.f32 2.0, %v73_v30  ;;  %v76_v36 = vld [vmem:[#allocation2 + $0x198] sm:$0xff]  ;;  %v202_v37 = vmul.f32 2.0, %v74_v32  ;;  %v77_v38 = vld [vmem:[#allocation2 + $0x1a0] sm:$0xff] }
  0x1b   :  { %299 = vst [vmem:[#allocation5 + $0x90] sm:$0xff] %v171_v39  ;;  %v203_v39 = vmul.f32 2.0, %v75_v34  ;;  %v78_v40 = vld [vmem:[#allocation2 + $0x1a8] sm:$0xff]  ;;  %v79_v42 = vld [vmem:[#allocation2 + $0x1b0] sm:$0xff]  ;;  %v80_v44 = vld [vmem:[#allocation2 + $0x1b8] sm:$0xff] }
  0x1c   :  { %300 = vst [vmem:[#allocation5 + $0x98] sm:$0xff] %v172_v41  ;;  %v204_v41 = vmul.f32 2.0, %v76_v36  ;;  %v81_v46 = vld [vmem:[#allocation2 + $0x1c0] sm:$0xff]  ;;  %v82_v48 = vld [vmem:[#allocation2 + $0x1c8] sm:$0xff]  ;;  %v83_v50 = vld [vmem:[#allocation2 + $0x1d0] sm:$0xff] }
  0x1d   :  { %301 = vst [vmem:[#allocation5 + $0xa0] sm:$0xff] %v173_v43  ;;  %v205_v43 = vmul.f32 2.0, %v77_v38  ;;  %v84_v52 = vld [vmem:[#allocation2 + $0x1d8] sm:$0xff]  ;;  %v85_v54 = vld [vmem:[#allocation2 + $0x1e0] sm:$0xff]  ;;  %v86_v56 = vld [vmem:[#allocation2 + $0x1e8] sm:$0xff] }
  0x1e   :  { %302 = vst [vmem:[#allocation5 + $0xa8] sm:$0xff] %v174_v45  ;;  %v206_v45 = vmul.f32 2.0, %v78_v40  ;;  %v87_v58 = vld [vmem:[#allocation2 + $0x1f0] sm:$0xff]  ;;  %v88_v60 = vld [vmem:[#allocation2 + $0x1f8] sm:$0xff]  ;;  %v89_v62 = vld [vmem:[#allocation2 + $0x200] sm:$0xff] }
  0x1f   :  { %303 = vst [vmem:[#allocation5 + $0xb0] sm:$0xff] %v175_v47  ;;  %v207_v47 = vmul.f32 2.0, %v79_v42  ;;  %v90_v0 = vld [vmem:[#allocation2 + $0x208] sm:$0xff]  ;;  %v91_v2 = vld [vmem:[#allocation2 + $0x210] sm:$0xff]  ;;  %v92_v4 = vld [vmem:[#allocation2 + $0x218] sm:$0xff] }
  0x20   :  { %304 = vst [vmem:[#allocation5 + $0xb8] sm:$0xff] %v176_v49  ;;  %v208_v49 = vmul.f32 2.0, %v80_v44  ;;  %v93_v6 = vld [vmem:[#allocation2 + $0x220] sm:$0xff]  ;;  %v94_v8 = vld [vmem:[#allocation2 + $0x228] sm:$0xff]  ;;  %v95_v10 = vld [vmem:[#allocation2 + $0x230] sm:$0xff] }
  0x21   :  { %305 = vst [vmem:[#allocation5 + $0xc0] sm:$0xff] %v177_v51  ;;  %v209_v51 = vmul.f32 2.0, %v81_v46  ;;  %v96_v12 = vld [vmem:[#allocation2 + $0x238] sm:$0xff]  ;;  %v97_v14 = vld [vmem:[#allocation2 + $0x240] sm:$0xff]  ;;  %v98_v16 = vld [vmem:[#allocation2 + $0x248] sm:$0xff] }
  0x22   :  { %306 = vst [vmem:[#allocation5 + $0xc8] sm:$0xff] %v178_v53  ;;  %v210_v53 = vmul.f32 2.0, %v82_v48  ;;  %v99_v18 = vld [vmem:[#allocation2 + $0x250] sm:$0xff]  ;;  %v100_v20 = vld [vmem:[#allocation2 + $0x258] sm:$0xff]  ;;  %v101_v22 = vld [vmem:[#allocation2 + $0x260] sm:$0xff] }
  0x23   :  { %307 = vst [vmem:[#allocation5 + $0xd0] sm:$0xff] %v179_v55  ;;  %v211_v55 = vmul.f32 2.0, %v83_v50  ;;  %v102_v24 = vld [vmem:[#allocation2 + $0x268] sm:$0xff]  ;;  %v103_v26 = vld [vmem:[#allocation2 + $0x270] sm:$0xff]  ;;  %v104_v28 = vld [vmem:[#allocation2 + $0x278] sm:$0xff] }
  0x24   :  { %308 = vst [vmem:[#allocation5 + $0xd8] sm:$0xff] %v180_v57  ;;  %v212_v57 = vmul.f32 2.0, %v84_v52  ;;  %v105_v30 = vld [vmem:[#allocation2 + $0x280] sm:$0xff]  ;;  %v106_v32 = vld [vmem:[#allocation2 + $0x288] sm:$0xff]  ;;  %v107_v34 = vld [vmem:[#allocation2 + $0x290] sm:$0xff] }
  0x25   :  { %309 = vst [vmem:[#allocation5 + $0xe0] sm:$0xff] %v181_v59  ;;  %v213_v59 = vmul.f32 2.0, %v85_v54  ;;  %v108_v36 = vld [vmem:[#allocation2 + $0x298] sm:$0xff]  ;;  %v109_v38 = vld [vmem:[#allocation2 + $0x2a0] sm:$0xff]  ;;  %v110_v40 = vld [vmem:[#allocation2 + $0x2a8] sm:$0xff] }
  0x26   :  { %310 = vst [vmem:[#allocation5 + $0xe8] sm:$0xff] %v182_v61  ;;  %v214_v61 = vmul.f32 2.0, %v86_v56  ;;  %v111_v42 = vld [vmem:[#allocation2 + $0x2b0] sm:$0xff]  ;;  %v112_v44 = vld [vmem:[#allocation2 + $0x2b8] sm:$0xff]  ;;  %v113_v46 = vld [vmem:[#allocation2 + $0x2c0] sm:$0xff] }
  0x27   :  { %311 = vst [vmem:[#allocation5 + $0xf0] sm:$0xff] %v183_v63  ;;  %v215_v63 = vmul.f32 2.0, %v87_v58  ;;  %v114_v48 = vld [vmem:[#allocation2 + $0x2c8] sm:$0xff]  ;;  %v115_v50 = vld [vmem:[#allocation2 + $0x2d0] sm:$0xff]  ;;  %v116_v52 = vld [vmem:[#allocation2 + $0x2d8] sm:$0xff] }
  0x28   :  { %312 = vst [vmem:[#allocation5 + $0xf8] sm:$0xff] %v184_v1  ;;  %v216_v1 = vmul.f32 2.0, %v88_v60  ;;  %v117_v54 = vld [vmem:[#allocation2 + $0x2e0] sm:$0xff]  ;;  %v118_v56 = vld [vmem:[#allocation2 + $0x2e8] sm:$0xff]  ;;  %v119_v58 = vld [vmem:[#allocation2 + $0x2f0] sm:$0xff] }
  0x29   :  { %313 = vst [vmem:[#allocation5 + $0x100] sm:$0xff] %v185_v3  ;;  %v217_v3 = vmul.f32 2.0, %v89_v62  ;;  %v120_v60 = vld [vmem:[#allocation2 + $0x2f8] sm:$0xff]  ;;  %v121_v62 = vld [vmem:[#allocation2 + $0x300] sm:$0xff] }
  0x2a   :  { %314 = vst [vmem:[#allocation5 + $0x108] sm:$0xff] %v186_v5  ;;  %v218_v5 = vmul.f32 2.0, %v90_v0  ;;  %v122_v0 = vld [vmem:[#allocation2 + $0x308] sm:$0xff] }
  0x2b   :  { %315 = vst [vmem:[#allocation5 + $0x110] sm:$0xff] %v187_v7  ;;  %v219_v7 = vmul.f32 2.0, %v91_v2  ;;  %v123_v2 = vld [vmem:[#allocation2 + $0x310] sm:$0xff] }
  0x2c   :  { %316 = vst [vmem:[#allocation5 + $0x118] sm:$0xff] %v188_v9  ;;  %v220_v9 = vmul.f32 2.0, %v92_v4  ;;  %v124_v4 = vld [vmem:[#allocation2 + $0x318] sm:$0xff] }
  0x2d   :  { %317 = vst [vmem:[#allocation5 + $0x120] sm:$0xff] %v189_v11  ;;  %v221_v11 = vmul.f32 2.0, %v93_v6  ;;  %v125_v6 = vld [vmem:[#allocation2 + $0x320] sm:$0xff] }
  0x2e   :  { %318 = vst [vmem:[#allocation5 + $0x128] sm:$0xff] %v190_v13  ;;  %v222_v13 = vmul.f32 2.0, %v94_v8  ;;  %v126_v8 = vld [vmem:[#allocation2 + $0x328] sm:$0xff] }
  0x2f   :  { %319 = vst [vmem:[#allocation5 + $0x130] sm:$0xff] %v191_v15  ;;  %v223_v15 = vmul.f32 2.0, %v95_v10  ;;  %v127_v10 = vld [vmem:[#allocation2 + $0x330] sm:$0xff] }
  0x30   :  { %320 = vst [vmem:[#allocation5 + $0x138] sm:$0xff] %v192_v17  ;;  %v224_v17 = vmul.f32 2.0, %v96_v12  ;;  %v128_v12 = vld [vmem:[#allocation2 + $0x338] sm:$0xff] }
  0x31   :  { %321 = vst [vmem:[#allocation5 + $0x140] sm:$0xff] %v193_v19  ;;  %v225_v19 = vmul.f32 2.0, %v97_v14  ;;  %v129_v14 = vld [vmem:[#allocation2 + $0x340] sm:$0xff] }
  0x32   :  { %322 = vst [vmem:[#allocation5 + $0x148] sm:$0xff] %v194_v21  ;;  %v226_v21 = vmul.f32 2.0, %v98_v16  ;;  %v130_v16 = vld [vmem:[#allocation2 + $0x348] sm:$0xff] }
  0x33   :  { %323 = vst [vmem:[#allocation5 + $0x150] sm:$0xff] %v195_v23  ;;  %v227_v23 = vmul.f32 2.0, %v99_v18  ;;  %v131_v18 = vld [vmem:[#allocation2 + $0x350] sm:$0xff] }
  0x34   :  { %324 = vst [vmem:[#allocation5 + $0x158] sm:$0xff] %v196_v25  ;;  %v228_v25 = vmul.f32 2.0, %v100_v20  ;;  %v132_v20 = vld [vmem:[#allocation2 + $0x358] sm:$0xff] }
  0x35   :  { %325 = vst [vmem:[#allocation5 + $0x160] sm:$0xff] %v197_v27  ;;  %v229_v27 = vmul.f32 2.0, %v101_v22  ;;  %v133_v22 = vld [vmem:[#allocation2 + $0x360] sm:$0xff] }
  0x36   :  { %326 = vst [vmem:[#allocation5 + $0x168] sm:$0xff] %v198_v29  ;;  %v230_v29 = vmul.f32 2.0, %v102_v24  ;;  %v134_v24 = vld [vmem:[#allocation2 + $0x368] sm:$0xff] }
  0x37   :  { %327 = vst [vmem:[#allocation5 + $0x170] sm:$0xff] %v199_v31  ;;  %v231_v31 = vmul.f32 2.0, %v103_v26  ;;  %v135_v26 = vld [vmem:[#allocation2 + $0x370] sm:$0xff] }
  0x38   :  { %328 = vst [vmem:[#allocation5 + $0x178] sm:$0xff] %v200_v33  ;;  %v232_v33 = vmul.f32 2.0, %v104_v28  ;;  %v136_v28 = vld [vmem:[#allocation2 + $0x378] sm:$0xff] }
  0x39   :  { %329 = vst [vmem:[#allocation5 + $0x180] sm:$0xff] %v201_v35  ;;  %v233_v35 = vmul.f32 2.0, %v105_v30  ;;  %v137_v30 = vld [vmem:[#allocation2 + $0x380] sm:$0xff] }
  0x3a   :  { %330 = vst [vmem:[#allocation5 + $0x188] sm:$0xff] %v202_v37  ;;  %v234_v37 = vmul.f32 2.0, %v106_v32  ;;  %v138_v32 = vld [vmem:[#allocation2 + $0x388] sm:$0xff] }
  0x3b   :  { %331 = vst [vmem:[#allocation5 + $0x190] sm:$0xff] %v203_v39  ;;  %v235_v39 = vmul.f32 2.0, %v107_v34  ;;  %v139_v34 = vld [vmem:[#allocation2 + $0x390] sm:$0xff] }
  0x3c   :  { %332 = vst [vmem:[#allocation5 + $0x198] sm:$0xff] %v204_v41  ;;  %v236_v41 = vmul.f32 2.0, %v108_v36  ;;  %v140_v36 = vld [vmem:[#allocation2 + $0x398] sm:$0xff] }
  0x3d   :  { %333 = vst [vmem:[#allocation5 + $0x1a0] sm:$0xff] %v205_v43  ;;  %v237_v43 = vmul.f32 2.0, %v109_v38  ;;  %v141_v38 = vld [vmem:[#allocation2 + $0x3a0] sm:$0xff] }
  0x3e   :  { %334 = vst [vmem:[#allocation5 + $0x1a8] sm:$0xff] %v206_v45  ;;  %v238_v45 = vmul.f32 2.0, %v110_v40  ;;  %v142_v40 = vld [vmem:[#allocation2 + $0x3a8] sm:$0xff] }
  0x3f   :  { %335 = vst [vmem:[#allocation5 + $0x1b0] sm:$0xff] %v207_v47  ;;  %v239_v47 = vmul.f32 2.0, %v111_v42  ;;  %v143_v42 = vld [vmem:[#allocation2 + $0x3b0] sm:$0xff] }
  0x40   :  { %336 = vst [vmem:[#allocation5 + $0x1b8] sm:$0xff] %v208_v49  ;;  %v240_v49 = vmul.f32 2.0, %v112_v44  ;;  %v144_v44 = vld [vmem:[#allocation2 + $0x3b8] sm:$0xff] }
  0x41   :  { %337 = vst [vmem:[#allocation5 + $0x1c0] sm:$0xff] %v209_v51  ;;  %v241_v51 = vmul.f32 2.0, %v113_v46  ;;  %v145_v46 = vld [vmem:[#allocation2 + $0x3c0] sm:$0xff] }
  0x42   :  { %338 = vst [vmem:[#allocation5 + $0x1c8] sm:$0xff] %v210_v53  ;;  %v242_v53 = vmul.f32 2.0, %v114_v48  ;;  %v146_v48 = vld [vmem:[#allocation2 + $0x3c8] sm:$0xff] }
  0x43   :  { %339 = vst [vmem:[#allocation5 + $0x1d0] sm:$0xff] %v211_v55  ;;  %v243_v55 = vmul.f32 2.0, %v115_v50  ;;  %v147_v50 = vld [vmem:[#allocation2 + $0x3d0] sm:$0xff] }
  0x44   :  { %340 = vst [vmem:[#allocation5 + $0x1d8] sm:$0xff] %v212_v57  ;;  %v244_v57 = vmul.f32 2.0, %v116_v52  ;;  %v148_v52 = vld [vmem:[#allocation2 + $0x3d8] sm:$0xff] }
  0x45   :  { %341 = vst [vmem:[#allocation5 + $0x1e0] sm:$0xff] %v213_v59  ;;  %v245_v59 = vmul.f32 2.0, %v117_v54  ;;  %v149_v54 = vld [vmem:[#allocation2 + $0x3e0] sm:$0xff] }
  0x46   :  { %342 = vst [vmem:[#allocation5 + $0x1e8] sm:$0xff] %v214_v61  ;;  %v246_v61 = vmul.f32 2.0, %v118_v56  ;;  %v150_v56 = vld [vmem:[#allocation2 + $0x3e8] sm:$0xff] }
  0x47   :  { %343 = vst [vmem:[#allocation5 + $0x1f0] sm:$0xff] %v215_v63  ;;  %v247_v63 = vmul.f32 2.0, %v119_v58  ;;  %v151_v58 = vld [vmem:[#allocation2 + $0x3f0] sm:$0xff] }
  0x48   :  { %344 = vst [vmem:[#allocation5 + $0x1f8] sm:$0xff] %v216_v1  ;;  %v248_v1 = vmul.f32 2.0, %v120_v60  ;;  %v152_v60 = vld [vmem:[#allocation2 + $0x3f8] sm:$0xff] }
  0x49   :  { %345 = vst [vmem:[#allocation5 + $0x200] sm:$0xff] %v217_v3  ;;  %v249_v3 = vmul.f32 2.0, %v121_v62  ;;  %v279_v62 = vmul.f32 2.0, %v151_v58 }
  0x4a   :  { %346 = vst [vmem:[#allocation5 + $0x208] sm:$0xff] %v218_v5  ;;  %v250_v5 = vmul.f32 2.0, %v122_v0 }
  0x4b   :  { %347 = vst [vmem:[#allocation5 + $0x210] sm:$0xff] %v219_v7  ;;  %v251_v7 = vmul.f32 2.0, %v123_v2 }
  0x4c   :  { %348 = vst [vmem:[#allocation5 + $0x218] sm:$0xff] %v220_v9  ;;  %v252_v9 = vmul.f32 2.0, %v124_v4 }
  0x4d   :  { %349 = vst [vmem:[#allocation5 + $0x220] sm:$0xff] %v221_v11  ;;  %v253_v11 = vmul.f32 2.0, %v125_v6 }
  0x4e   :  { %350 = vst [vmem:[#allocation5 + $0x228] sm:$0xff] %v222_v13  ;;  %v254_v13 = vmul.f32 2.0, %v126_v8 }
  0x4f   :  { %351 = vst [vmem:[#allocation5 + $0x230] sm:$0xff] %v223_v15  ;;  %v255_v15 = vmul.f32 2.0, %v127_v10 }
  0x50   :  { %352 = vst [vmem:[#allocation5 + $0x238] sm:$0xff] %v224_v17  ;;  %v256_v17 = vmul.f32 2.0, %v128_v12 }
  0x51   :  { %353 = vst [vmem:[#allocation5 + $0x240] sm:$0xff] %v225_v19  ;;  %v257_v19 = vmul.f32 2.0, %v129_v14 }
  0x52   :  { %354 = vst [vmem:[#allocation5 + $0x248] sm:$0xff] %v226_v21  ;;  %v258_v21 = vmul.f32 2.0, %v130_v16 }
  0x53   :  { %355 = vst [vmem:[#allocation5 + $0x250] sm:$0xff] %v227_v23  ;;  %v259_v23 = vmul.f32 2.0, %v131_v18 }
  0x54   :  { %356 = vst [vmem:[#allocation5 + $0x258] sm:$0xff] %v228_v25  ;;  %v260_v25 = vmul.f32 2.0, %v132_v20 }
  0x55   :  { %357 = vst [vmem:[#allocation5 + $0x260] sm:$0xff] %v229_v27  ;;  %v261_v27 = vmul.f32 2.0, %v133_v22 }
  0x56   :  { %358 = vst [vmem:[#allocation5 + $0x268] sm:$0xff] %v230_v29  ;;  %v262_v29 = vmul.f32 2.0, %v134_v24 }
  0x57   :  { %359 = vst [vmem:[#allocation5 + $0x270] sm:$0xff] %v231_v31  ;;  %v263_v31 = vmul.f32 2.0, %v135_v26 }
  0x58   :  { %360 = vst [vmem:[#allocation5 + $0x278] sm:$0xff] %v232_v33  ;;  %v264_v33 = vmul.f32 2.0, %v136_v28 }
  0x59   :  { %361 = vst [vmem:[#allocation5 + $0x280] sm:$0xff] %v233_v35  ;;  %v265_v35 = vmul.f32 2.0, %v137_v30 }
  0x5a   :  { %362 = vst [vmem:[#allocation5 + $0x288] sm:$0xff] %v234_v37  ;;  %v266_v37 = vmul.f32 2.0, %v138_v32 }
  0x5b   :  { %363 = vst [vmem:[#allocation5 + $0x290] sm:$0xff] %v235_v39  ;;  %v267_v39 = vmul.f32 2.0, %v139_v34 }
  0x5c   :  { %364 = vst [vmem:[#allocation5 + $0x298] sm:$0xff] %v236_v41  ;;  %v268_v41 = vmul.f32 2.0, %v140_v36 }
  0x5d   :  { %365 = vst [vmem:[#allocation5 + $0x2a0] sm:$0xff] %v237_v43  ;;  %v269_v43 = vmul.f32 2.0, %v141_v38 }
  0x5e   :  { %366 = vst [vmem:[#allocation5 + $0x2a8] sm:$0xff] %v238_v45  ;;  %v270_v45 = vmul.f32 2.0, %v142_v40 }
  0x5f   :  { %367 = vst [vmem:[#allocation5 + $0x2b0] sm:$0xff] %v239_v47  ;;  %v271_v47 = vmul.f32 2.0, %v143_v42 }
  0x60   :  { %368 = vst [vmem:[#allocation5 + $0x2b8] sm:$0xff] %v240_v49  ;;  %v272_v49 = vmul.f32 2.0, %v144_v44 }
  0x61   :  { %369 = vst [vmem:[#allocation5 + $0x2c0] sm:$0xff] %v241_v51  ;;  %v273_v51 = vmul.f32 2.0, %v145_v46 }
  0x62   :  { %370 = vst [vmem:[#allocation5 + $0x2c8] sm:$0xff] %v242_v53  ;;  %v274_v53 = vmul.f32 2.0, %v146_v48 }
  0x63   :  { %371 = vst [vmem:[#allocation5 + $0x2d0] sm:$0xff] %v243_v55  ;;  %v275_v55 = vmul.f32 2.0, %v147_v50 }
  0x64   :  { %372 = vst [vmem:[#allocation5 + $0x2d8] sm:$0xff] %v244_v57  ;;  %v276_v57 = vmul.f32 2.0, %v148_v52 }
  0x65   :  { %373 = vst [vmem:[#allocation5 + $0x2e0] sm:$0xff] %v245_v59  ;;  %v277_v59 = vmul.f32 2.0, %v149_v54 }
  0x66   :  { %374 = vst [vmem:[#allocation5 + $0x2e8] sm:$0xff] %v246_v61  ;;  %v278_v61 = vmul.f32 2.0, %v150_v56 }
  0x67   :  { %375 = vst [vmem:[#allocation5 + $0x2f0] sm:$0xff] %v247_v63  ;;  %v280_v63 = vmul.f32 2.0, %v152_v60 }
  0x68   :  { %376 = vst [vmem:[#allocation5 + $0x2f8] sm:$0xff] %v248_v1 }
  0x69   :  { %377 = vst [vmem:[#allocation5 + $0x300] sm:$0xff] %v249_v3 }
  0x6a   :  { %378 = vst [vmem:[#allocation5 + $0x308] sm:$0xff] %v250_v5 }
  0x6b   :  { %379 = vst [vmem:[#allocation5 + $0x310] sm:$0xff] %v251_v7 }
  0x6c   :  { %380 = vst [vmem:[#allocation5 + $0x318] sm:$0xff] %v252_v9 }
  0x6d   :  { %381 = vst [vmem:[#allocation5 + $0x320] sm:$0xff] %v253_v11 }
  0x6e   :  { %382 = vst [vmem:[#allocation5 + $0x328] sm:$0xff] %v254_v13 }
  0x6f   :  { %383 = vst [vmem:[#allocation5 + $0x330] sm:$0xff] %v255_v15 }
  0x70   :  { %384 = vst [vmem:[#allocation5 + $0x338] sm:$0xff] %v256_v17 }
  0x71   :  { %385 = vst [vmem:[#allocation5 + $0x340] sm:$0xff] %v257_v19 }
  0x72   :  { %386 = vst [vmem:[#allocation5 + $0x348] sm:$0xff] %v258_v21 }
  0x73   :  { %387 = vst [vmem:[#allocation5 + $0x350] sm:$0xff] %v259_v23 }
  0x74   :  { %388 = vst [vmem:[#allocation5 + $0x358] sm:$0xff] %v260_v25 }
  0x75   :  { %389 = vst [vmem:[#allocation5 + $0x360] sm:$0xff] %v261_v27 }
  0x76   :  { %390 = vst [vmem:[#allocation5 + $0x368] sm:$0xff] %v262_v29 }
  0x77   :  { %391 = vst [vmem:[#allocation5 + $0x370] sm:$0xff] %v263_v31 }
  0x78   :  { %392 = vst [vmem:[#allocation5 + $0x378] sm:$0xff] %v264_v33 }
  0x79   :  { %393 = vst [vmem:[#allocation5 + $0x380] sm:$0xff] %v265_v35 }
  0x7a   :  { %394 = vst [vmem:[#allocation5 + $0x388] sm:$0xff] %v266_v37 }
  0x7b   :  { %395 = vst [vmem:[#allocation5 + $0x390] sm:$0xff] %v267_v39 }
  0x7c   :  { %396 = vst [vmem:[#allocation5 + $0x398] sm:$0xff] %v268_v41 }
  0x7d   :  { %397 = vst [vmem:[#allocation5 + $0x3a0] sm:$0xff] %v269_v43 }
  0x7e   :  { %398 = vst [vmem:[#allocation5 + $0x3a8] sm:$0xff] %v270_v45 }
  0x7f   :  { %399 = vst [vmem:[#allocation5 + $0x3b0] sm:$0xff] %v271_v47 }
  0x80   :  { %400 = vst [vmem:[#allocation5 + $0x3b8] sm:$0xff] %v272_v49 }
  0x81   :  { %401 = vst [vmem:[#allocation5 + $0x3c0] sm:$0xff] %v273_v51 }
  0x82   :  { %402 = vst [vmem:[#allocation5 + $0x3c8] sm:$0xff] %v274_v53 }
  0x83   :  { %403 = vst [vmem:[#allocation5 + $0x3d0] sm:$0xff] %v275_v55 }
  0x84   :  { %404 = vst [vmem:[#allocation5 + $0x3d8] sm:$0xff] %v276_v57 }
  0x85   :  { %405 = vst [vmem:[#allocation5 + $0x3e0] sm:$0xff] %v277_v59 }
  0x86   :  { %406 = vst [vmem:[#allocation5 + $0x3e8] sm:$0xff] %v278_v61 }
  0x87   :  { %407 = vst [vmem:[#allocation5 + $0x3f0] sm:$0xff] %v279_v62 }
  0x88   :  { %408 = vst [vmem:[#allocation5 + $0x3f8] sm:$0xff] %v280_v63 }
  0x89   :  { %421 = dma.vmem_to_hbm [thread:$0]  %s414_s13, 16384, %s416_s16, [#allocation4], %s485_s11, %s485_s11, %s486_s12  }
  0x8a   :  { %482 = dma.done.wait [#allocation4], 16384  }
  0x8b   :  { %483 = vsyncadd [#allocation4], 4294950912 }
  0x8c   :  { %426 = vsyncpa [#allocation3], 1 }
  0x8d   :  { %427 = vsyncpa [#allocation4], 1 }

</bundles_post_ra>
